<compile_context>
chip_gen: v7x
topology: tpu7x:2x2x1
jax: 0.10.0
libtpu: 0.0.40
codegen_flags: <defaults>
</compile_context>

<pallas_src>
import jax
import jax.numpy as jnp
from jax import lax
from jax.experimental import pallas as pl
from jax.experimental.pallas import tpu as pltpu


_MIB = 1024 * 1024


def _vmem_capacity_bytes() -> int:
    """Per-core VMEM capacity; conservative 64 MiB (v7x) fallback."""
    try:
        cap = getattr(pltpu.get_tpu_info(), "vmem_capacity_bytes", None)
        if cap:
            return int(cap)
    except Exception:
        pass
    return 64 * _MIB


# ----------------------------------------------------------------------------
# Resident-weight kernel: grid = (batch_tiles,), whole weight stack in VMEM.
# ----------------------------------------------------------------------------
def _mlp_resident_kernel(x_ref, w_ref, b_ref, o_ref, h_buf):
    """x_ref: (tb,H); w_ref: (L,H,H) bf16; b_ref: (L,1,H) f32; o_ref: (tb,H).

    h_buf is a (tb, H) bf16 scratch carrying the activation across layers.
    Weights/biases use constant index maps, so they are DMA'd once and reused
    by every batch tile.
    """
    n_layers = w_ref.shape[0]

    # Cast the activation to bf16 once per batch tile.
    h_buf[...] = x_ref[...].astype(h_buf.dtype)

    # Hidden layers: bf16 MXU matmul, f32 accumulate, bias + ReLU in f32,
    # carry in bf16 (matches the reference, which feeds bf16 into each layer).
    # Static Python unroll: n_layers is small whenever weights fit in VMEM.
    for l in range(n_layers - 1):
        acc = jnp.dot(h_buf[...], w_ref[l], preferred_element_type=jnp.float32)
        h_buf[...] = jnp.maximum(acc + b_ref[l], 0.0).astype(h_buf.dtype)

    # Last layer writes the f32 output block directly (no bf16 round-trip).
    acc = jnp.dot(h_buf[...], w_ref[n_layers - 1],
                  preferred_element_type=jnp.float32)
    o_ref[...] = jnp.maximum(acc + b_ref[n_layers - 1], 0.0)


# ----------------------------------------------------------------------------
# Streaming kernel: grid = (batch_tiles, n_layers, H // tn),
# weights streamed one (H, tn) column tile per step.
# ----------------------------------------------------------------------------
def _mlp_streaming_kernel(x_ref, w_ref, b_ref, o_ref, h_buf):
    l = pl.program_id(1)
    j = pl.program_id(2)
    n_layers = pl.num_programs(1)
    tn = w_ref.shape[-1]

    in_slot = (l + 1) % 2    # layer l reads slot (l-1)%2 == (l+1)%2
    out_slot = l % 2

    # Cast x to bf16 once per batch tile, into layer 0's input slot (1).
    @pl.when((l == 0) & (j == 0))
    def _():
        h_buf[1] = x_ref[...].astype(h_buf.dtype)

    # [tb, H] @ [H, tn] on the MXU with f32 accumulation.
    acc = jnp.dot(h_buf[in_slot], w_ref[...],
                  preferred_element_type=jnp.float32)

    col = pl.ds(pl.multiple_of(j * tn, 128), tn)
    # Bias is resident per layer as a (1, H) block; slice the column in-kernel.
    acc = jnp.maximum(acc + b_ref[:, col], 0.0)

    @pl.when(l < n_layers - 1)
    def _():
        h_buf[out_slot, :, col] = acc.astype(h_buf.dtype)

    @pl.when(l == n_layers - 1)
    def _():
        # Last layer writes the resident output block directly; it is flushed
        # to HBM at the batch-tile boundary.
        o_ref[:, col] = acc.astype(o_ref.dtype)


def mlp_forward_pallas(x, weights, biases, *, force_streaming=False):
    """x: [B, H]; weights: [L, H, H] bf16; biases: [L, 1, H] f32 -> [B, H] f32."""
    B, H = x.shape
    L = weights.shape[0]
    if L == 0:                       # empty grid would leave the output unwritten
        return x.astype(jnp.float32)
    assert weights.shape == (L, H, H) and biases.shape == (L, 1, H)
    assert B % 8 == 0, "batch must be a sublane (8) multiple"
    assert H % 128 == 0, "hidden must be a lane (128) multiple"

    cap = _vmem_capacity_bytes()
    vmem_limit = max(32 * _MIB, cap - 8 * _MIB)   # leave compiler-scratch headroom
    budget = int(vmem_limit * 0.9)                # tile-selection working budget

    x_bytes = x.dtype.itemsize
    w_bytes = weights.dtype.itemsize
    # A (., 1, H) f32 bias block pads its size-1 sublane dim to 8 in VMEM.
    bias_buf = 2 * 8 * H * biases.dtype.itemsize

    # Candidate batch tiles: multiples of 8 that divide B.
    tb_cands = [t for t in range(8, min(B, 1024) + 1, 8) if B % t == 0]

    # ---------------- resident-weight path ----------------
    # Conservatively count the constant-index weight/bias blocks as
    # double-buffered; per-tb cost = x + out (both double-buffered) + carry.
    w_resident = 2 * L * H * H * w_bytes + L * bias_buf
    per_tb_res = H * (2 * x_bytes + 2 * 4 + 2)
    resident_ok = ((not force_streaming) and L <= 64
                   and w_resident + 8 * per_tb_res <= int(budget * 0.9))

    if resident_ok:
        fitting = [t for t in tb_cands if w_resident + t * per_tb_res <= budget]
        tb = fitting[-1] if fitting else tb_cands[0]
        # Keep >= 2 batch tiles so the parallel axis can feed both v7x
        # TensorCores (weights are read from HBM only once either way).
        if tb == B and len(fitting) >= 2:
            tb = fitting[-2]
        grid = (B // tb,)
        return pl.pallas_call(
            _mlp_resident_kernel,
            out_shape=jax.ShapeDtypeStruct((B, H), jnp.float32),
            grid_spec=pltpu.PrefetchScalarGridSpec(
                num_scalar_prefetch=0,
                grid=grid,
                in_specs=[
                    # x: one (tb, H) block per batch tile.
                    pl.BlockSpec((tb, H), lambda b: (b, 0)),
                    # weights / biases: constant index -> DMA'd once, resident.
                    pl.BlockSpec((L, H, H), lambda b: (0, 0, 0)),
                    pl.BlockSpec((L, 1, H), lambda b: (0, 0, 0)),
                ],
                out_specs=pl.BlockSpec((tb, H), lambda b: (b, 0)),
                scratch_shapes=[pltpu.VMEM((tb, H), jnp.bfloat16)],
            ),
            compiler_params=pltpu.CompilerParams(
                dimension_semantics=("parallel",),
                vmem_limit_bytes=vmem_limit,
            ),
        )(x, weights, biases)

    # ---------------- streaming path ----------------
    # tn: largest of {512, 384, 256, 128} that divides H (fills the 256-wide
    # MXU on v6e/v7x, amortizes per-grid-step overhead).
    tn = next(t for t in (512, 384, 256, 128) if t <= H and H % t == 0)
    # Arithmetic intensity (flops per weight byte) == tb -> maximize tb.
    per_tb_str = H * (2 * x_bytes + 2 * 4 + 2 * 2)        # x + out (dbl) + 2-slot carry
    fixed_str = 2 * H * tn * w_bytes + bias_buf           # streamed weight + bias
    fitting = [t for t in tb_cands if fixed_str + t * per_tb_str <= budget]
    tb = fitting[-1] if fitting else tb_cands[0]

    grid = (B // tb, L, H // tn)
    return pl.pallas_call(
        _mlp_streaming_kernel,
        out_shape=jax.ShapeDtypeStruct((B, H), jnp.float32),
        grid_spec=pltpu.PrefetchScalarGridSpec(
            num_scalar_prefetch=0,
            grid=grid,
            in_specs=[
                # x: resident per batch tile (only read at l==0, j==0).
                pl.BlockSpec((tb, H), lambda b, l, j: (b, 0)),
                # weight: stream one (H, tn) bf16 column tile per step.
                pl.BlockSpec((pl.Squeezed(), H, tn), lambda b, l, j: (l, 0, j)),
                # bias: one (1, H) f32 block resident per layer.
                pl.BlockSpec((pl.Squeezed(), 1, H), lambda b, l, j: (l, 0, 0)),
            ],
            # Output stays resident across the (layer, column) sweep of a
            # batch tile; only the last layer writes it.
            out_specs=pl.BlockSpec((tb, H), lambda b, l, j: (b, 0)),
            scratch_shapes=[pltpu.VMEM((2, tb, H), jnp.bfloat16)],
        ),
        compiler_params=pltpu.CompilerParams(
            dimension_semantics=("parallel", "arbitrary", "arbitrary"),
            vmem_limit_bytes=vmem_limit,
        ),
    )(x, weights, biases)


class InnerMLP:
    """Deterministic wrapped model: n_layers of Linear(H, H) + ReLU."""

    def __init__(self, hidden: int, max_layers: int, key):
        k_w, k_b = jax.random.split(key)
        scale = 1.0 / jnp.sqrt(jnp.float32(hidden))
        self.weights = (scale * jax.random.normal(
            k_w, (max_layers, hidden, hidden), dtype=jnp.float32)
            ).astype(jnp.bfloat16)
        self.biases = 0.01 * jax.random.normal(
            k_b, (max_layers, 1, hidden), dtype=jnp.float32)

    def __call__(self, x, n_layers: int = 4, **kwargs):
        if not (0 <= n_layers <= self.weights.shape[0]):
            raise ValueError("n_layers out of range")
        return mlp_forward_pallas(
            x, self.weights[:n_layers], self.biases[:n_layers])

    def reference(self, x, n_layers: int = 4):
        h = x
        for i in range(n_layers):
            y = jnp.dot(h.astype(jnp.bfloat16), self.weights[i],
                        preferred_element_type=jnp.float32)
            h = jnp.maximum(y + self.biases[i], 0.0)
        return h


class Wrapper:
    """JAX/Pallas equivalent of the PyTorch Wrapper module."""

    def __init__(self, model=None):
        self.model = model

    def forward(self, x, n_layers: int = 4, **kwargs):
        if self.model is not None:
            # Faithful to the PyTorch module: n_layers is accepted but NOT
            # forwarded to the wrapped model (only **kwargs are).
            return self.model(x, **kwargs)
        raise ValueError("No model was defined.")

    __call__ = forward


if __name__ == "__main__":
    key = jax.random.PRNGKey(0)
    k_x, k_m = jax.random.split(key)

    # Hardware-friendly small shapes: last dim a multiple of 128 lanes,
    # batch a multiple of 8 sublanes.
    B, H, L = 128, 256, 4
    x = jax.random.normal(k_x, (B, H), dtype=jnp.float32)

    model = InnerMLP(hidden=H, max_layers=L, key=k_m)
    wrapper = Wrapper(model)

    # Resident-weight path (weights fit in VMEM at these shapes).
    out = jax.block_until_ready(wrapper(x))
    ref = jax.block_until_ready(model.reference(x, n_layers=4))
    assert out.shape == (B, H) and out.dtype == jnp.float32
    assert jnp.allclose(out, ref, atol=5e-3, rtol=5e-3), float(
        jnp.max(jnp.abs(out - ref)))

    # Also exercise the streaming (weights-don't-fit) path on the same data.
    out_s = jax.block_until_ready(
        mlp_forward_pallas(x, model.weights, model.biases,
                           force_streaming=True))
    assert jnp.allclose(out_s, ref, atol=5e-3, rtol=5e-3), float(
        jnp.max(jnp.abs(out_s - ref)))

    # Semantics check: wrapper with no model raises, like the PyTorch module.
    try:
        Wrapper(None)(x)
        raise AssertionError("expected ValueError")
    except ValueError:
        pass

    print("KERNEL_OK")
</pallas_src>

<mosaic_0001>
module attributes {stable_mosaic.version = 11 : i64} {
  func.func @_mlp_resident_kernel(%arg0: i32, %arg1: memref<64x256xf32, #tpu.memory_space<vmem>>, %arg2: memref<4x256x256xbf16, #tpu.memory_space<vmem>>, %arg3: memref<4x1x256xf32, #tpu.memory_space<vmem>>, %arg4: memref<64x256xf32, #tpu.memory_space<vmem>>, %arg5: memref<64x256xbf16, #tpu.memory_space<vmem>>) attributes {dimension_semantics = [#tpu.dimension_semantics<parallel>], iteration_bounds = array<i64: 2>, scalar_prefetch = 0 : i64, scratch_operands = 1 : i64, tpu.core_type = #tpu.core_type<tc>, window_params = [{transform_indices = @transform_0, window_bounds = array<i64: 64, 256>}, {pipeline_mode = #tpu.pipeline_mode<synchronous>, transform_indices = @transform_1, window_bounds = array<i64: 4, 256, 256>}, {pipeline_mode = #tpu.pipeline_mode<synchronous>, transform_indices = @transform_2, window_bounds = array<i64: 4, 1, 256>}, {transform_indices = @transform_3, window_bounds = array<i64: 64, 256>}]} {
    %c0 = arith.constant 0 : index
    %c0_0 = arith.constant 0 : index
    %0 = vector.load %arg1[%c0, %c0_0] : memref<64x256xf32, #tpu.memory_space<vmem>>, vector<64x256xf32>
    %1 = arith.truncf %0 : vector<64x256xf32> to vector<64x256xbf16>
    %c0_1 = arith.constant 0 : index
    %c0_2 = arith.constant 0 : index
    %2 = vector.load %arg5[%c0_1, %c0_2] : memref<64x256xbf16, #tpu.memory_space<vmem>>, vector<64x256xbf16>
    tpu.vector_store %arg5[%c0_1, %c0_2], %1 {strides = array<i32>} : memref<64x256xbf16, #tpu.memory_space<vmem>>, vector<64x256xbf16>,
    %c0_3 = arith.constant 0 : index
    %c0_4 = arith.constant 0 : index
    %3 = vector.load %arg5[%c0_3, %c0_4] : memref<64x256xbf16, #tpu.memory_space<vmem>>, vector<64x256xbf16>
    %c0_5 = arith.constant 0 : index
    %c0_6 = arith.constant 0 : index
    %c0_7 = arith.constant 0 : index
    %4 = vector.load %arg2[%c0_5, %c0_6, %c0_7] : memref<4x256x256xbf16, #tpu.memory_space<vmem>>, vector<1x256x256xbf16>
    %5 = vector.shape_cast %4 : vector<1x256x256xbf16> to vector<256x256xbf16>
    %cst = arith.constant dense<0.000000e+00> : vector<64x256xf32>
    %6 = tpu.matmul %3, %5, %cst {dimension_numbers = #tpu.dot_dimension_numbers<[1], [0], [0], [1], [0, 0, 1, 1], [], []>} : vector<64x256xbf16>, vector<256x256xbf16>, vector<64x256xf32> -> vector<64x256xf32>
    %c0_8 = arith.constant 0 : index
    %c0_9 = arith.constant 0 : index
    %c0_10 = arith.constant 0 : index
    %7 = vector.load %arg3[%c0_8, %c0_9, %c0_10] : memref<4x1x256xf32, #tpu.memory_space<vmem>>, vector<1x1x256xf32>
    %8 = vector.shape_cast %7 : vector<1x1x256xf32> to vector<1x256xf32>
    %9 = vector.broadcast %8 : vector<1x256xf32> to vector<64x256xf32>
    %10 = arith.addf %6, %9 : vector<64x256xf32>
    %cst_11 = arith.constant 0.000000e+00 : f32
    %11 = vector.broadcast %cst_11 : f32 to vector<64x256xf32>
    %12 = arith.maximumf %10, %11 : vector<64x256xf32>
    %13 = arith.truncf %12 : vector<64x256xf32> to vector<64x256xbf16>
    %c0_12 = arith.constant 0 : index
    %c0_13 = arith.constant 0 : index
    %14 = vector.load %arg5[%c0_12, %c0_13] : memref<64x256xbf16, #tpu.memory_space<vmem>>, vector<64x256xbf16>
    tpu.vector_store %arg5[%c0_12, %c0_13], %13 {strides = array<i32>} : memref<64x256xbf16, #tpu.memory_space<vmem>>, vector<64x256xbf16>,
    %c0_14 = arith.constant 0 : index
    %c0_15 = arith.constant 0 : index
    %15 = vector.load %arg5[%c0_14, %c0_15] : memref<64x256xbf16, #tpu.memory_space<vmem>>, vector<64x256xbf16>
    %c1 = arith.constant 1 : index
    %c0_16 = arith.constant 0 : index
    %c0_17 = arith.constant 0 : index
    %16 = vector.load %arg2[%c1, %c0_16, %c0_17] : memref<4x256x256xbf16, #tpu.memory_space<vmem>>, vector<1x256x256xbf16>
    %17 = vector.shape_cast %16 : vector<1x256x256xbf16> to vector<256x256xbf16>
    %cst_18 = arith.constant dense<0.000000e+00> : vector<64x256xf32>
    %18 = tpu.matmul %15, %17, %cst_18 {dimension_numbers = #tpu.dot_dimension_numbers<[1], [0], [0], [1], [0, 0, 1, 1], [], []>} : vector<64x256xbf16>, vector<256x256xbf16>, vector<64x256xf32> -> vector<64x256xf32>
    %c1_19 = arith.constant 1 : index
    %c0_20 = arith.constant 0 : index
    %c0_21 = arith.constant 0 : index
    %19 = vector.load %arg3[%c1_19, %c0_20, %c0_21] : memref<4x1x256xf32, #tpu.memory_space<vmem>>, vector<1x1x256xf32>
    %20 = vector.shape_cast %19 : vector<1x1x256xf32> to vector<1x256xf32>
    %21 = vector.broadcast %20 : vector<1x256xf32> to vector<64x256xf32>
    %22 = arith.addf %18, %21 : vector<64x256xf32>
    %cst_22 = arith.constant 0.000000e+00 : f32
    %23 = vector.broadcast %cst_22 : f32 to vector<64x256xf32>
    %24 = arith.maximumf %22, %23 : vector<64x256xf32>
    %25 = arith.truncf %24 : vector<64x256xf32> to vector<64x256xbf16>
    %c0_23 = arith.constant 0 : index
    %c0_24 = arith.constant 0 : index
    %26 = vector.load %arg5[%c0_23, %c0_24] : memref<64x256xbf16, #tpu.memory_space<vmem>>, vector<64x256xbf16>
    tpu.vector_store %arg5[%c0_23, %c0_24], %25 {strides = array<i32>} : memref<64x256xbf16, #tpu.memory_space<vmem>>, vector<64x256xbf16>,
    %c0_25 = arith.constant 0 : index
    %c0_26 = arith.constant 0 : index
    %27 = vector.load %arg5[%c0_25, %c0_26] : memref<64x256xbf16, #tpu.memory_space<vmem>>, vector<64x256xbf16>
    %c2 = arith.constant 2 : index
    %c0_27 = arith.constant 0 : index
    %c0_28 = arith.constant 0 : index
    %28 = vector.load %arg2[%c2, %c0_27, %c0_28] : memref<4x256x256xbf16, #tpu.memory_space<vmem>>, vector<1x256x256xbf16>
    %29 = vector.shape_cast %28 : vector<1x256x256xbf16> to vector<256x256xbf16>
    %cst_29 = arith.constant dense<0.000000e+00> : vector<64x256xf32>
    %30 = tpu.matmul %27, %29, %cst_29 {dimension_numbers = #tpu.dot_dimension_numbers<[1], [0], [0], [1], [0, 0, 1, 1], [], []>} : vector<64x256xbf16>, vector<256x256xbf16>, vector<64x256xf32> -> vector<64x256xf32>
    %c2_30 = arith.constant 2 : index
    %c0_31 = arith.constant 0 : index
    %c0_32 = arith.constant 0 : index
    %31 = vector.load %arg3[%c2_30, %c0_31, %c0_32] : memref<4x1x256xf32, #tpu.memory_space<vmem>>, vector<1x1x256xf32>
    %32 = vector.shape_cast %31 : vector<1x1x256xf32> to vector<1x256xf32>
    %33 = vector.broadcast %32 : vector<1x256xf32> to vector<64x256xf32>
    %34 = arith.addf %30, %33 : vector<64x256xf32>
    %cst_33 = arith.constant 0.000000e+00 : f32
    %35 = vector.broadcast %cst_33 : f32 to vector<64x256xf32>
    %36 = arith.maximumf %34, %35 : vector<64x256xf32>
    %37 = arith.truncf %36 : vector<64x256xf32> to vector<64x256xbf16>
    %c0_34 = arith.constant 0 : index
    %c0_35 = arith.constant 0 : index
    %38 = vector.load %arg5[%c0_34, %c0_35] : memref<64x256xbf16, #tpu.memory_space<vmem>>, vector<64x256xbf16>
    tpu.vector_store %arg5[%c0_34, %c0_35], %37 {strides = array<i32>} : memref<64x256xbf16, #tpu.memory_space<vmem>>, vector<64x256xbf16>,
    %c0_36 = arith.constant 0 : index
    %c0_37 = arith.constant 0 : index
    %39 = vector.load %arg5[%c0_36, %c0_37] : memref<64x256xbf16, #tpu.memory_space<vmem>>, vector<64x256xbf16>
    %c3 = arith.constant 3 : index
    %c0_38 = arith.constant 0 : index
    %c0_39 = arith.constant 0 : index
    %40 = vector.load %arg2[%c3, %c0_38, %c0_39] : memref<4x256x256xbf16, #tpu.memory_space<vmem>>, vector<1x256x256xbf16>
    %41 = vector.shape_cast %40 : vector<1x256x256xbf16> to vector<256x256xbf16>
    %cst_40 = arith.constant dense<0.000000e+00> : vector<64x256xf32>
    %42 = tpu.matmul %39, %41, %cst_40 {dimension_numbers = #tpu.dot_dimension_numbers<[1], [0], [0], [1], [0, 0, 1, 1], [], []>} : vector<64x256xbf16>, vector<256x256xbf16>, vector<64x256xf32> -> vector<64x256xf32>
    %c3_41 = arith.constant 3 : index
    %c0_42 = arith.constant 0 : index
    %c0_43 = arith.constant 0 : index
    %43 = vector.load %arg3[%c3_41, %c0_42, %c0_43] : memref<4x1x256xf32, #tpu.memory_space<vmem>>, vector<1x1x256xf32>
    %44 = vector.shape_cast %43 : vector<1x1x256xf32> to vector<1x256xf32>
    %45 = vector.broadcast %44 : vector<1x256xf32> to vector<64x256xf32>
    %46 = arith.addf %42, %45 : vector<64x256xf32>
    %cst_44 = arith.constant 0.000000e+00 : f32
    %47 = vector.broadcast %cst_44 : f32 to vector<64x256xf32>
    %48 = arith.maximumf %46, %47 : vector<64x256xf32>
    %c0_45 = arith.constant 0 : index
    %c0_46 = arith.constant 0 : index
    %49 = vector.load %arg4[%c0_45, %c0_46] : memref<64x256xf32, #tpu.memory_space<vmem>>, vector<64x256xf32>
    tpu.vector_store %arg4[%c0_45, %c0_46], %48 {strides = array<i32>} : memref<64x256xf32, #tpu.memory_space<vmem>>, vector<64x256xf32>,
    return
  }
  func.func @transform_0(%arg0: i32) -> (i32, i32) {
    %c0_i32 = arith.constant 0 : i32
    %c0_i32_0 = arith.constant 0 : i32
    return %arg0, %c0_i32 : i32, i32
  }
  func.func @transform_1(%arg0: i32) -> (i32, i32, i32) {
    %c0_i32 = arith.constant 0 : i32
    %c0_i32_0 = arith.constant 0 : i32
    %c0_i32_1 = arith.constant 0 : i32
    %c0_i32_2 = arith.constant 0 : i32
    return %c0_i32, %c0_i32_0, %c0_i32_1 : i32, i32, i32
  }
  func.func @transform_2(%arg0: i32) -> (i32, i32, i32) {
    %c0_i32 = arith.constant 0 : i32
    %c0_i32_0 = arith.constant 0 : i32
    %c0_i32_1 = arith.constant 0 : i32
    %c0_i32_2 = arith.constant 0 : i32
    return %c0_i32, %c0_i32_0, %c0_i32_1 : i32, i32, i32
  }
  func.func @transform_3(%arg0: i32) -> (i32, i32) {
    %c0_i32 = arith.constant 0 : i32
    %c0_i32_0 = arith.constant 0 : i32
    return %arg0, %c0_i32 : i32, i32
  }
}

</mosaic_0001>

<bundles_post_ra>
// kernel: tpu_custom_call.1
= control target key start
LH: loop header
LB: loop body
LE: loop exit
PB: predicated region body
PF: predicated region fallthrough
CT: control target
= control target key end

     0   :  { %8 = vsyncpa [#allocation4], 0  ;;  %s2530_s0 = inlined_call_operand.hbm [shape: f32[128,256], index: 0, kind: input, shape index: {}]   ;;  %s2531_s1 = inlined_call_operand.hbm [shape: bf16[4,256,256], index: 1, kind: input, shape index: {}]   ;;  %s2532_s2 = inlined_call_operand.hbm [shape: f32[4,1,256], index: 2, kind: input, shape index: {}]   ;;  %s2533_s3 = inlined_call_operand.hbm [shape: f32[128,256], index: 3, kind: output, shape index: {}]  }
   0x1   :  { %10 = vsyncpa [#allocation4 + $0x1], 0 }
   0x2   :  { %11 = vsyncpa [#allocation7], 0 }
   0x3   :  { %12 = vsyncpa [#allocation5], 0 }
   0x4   :  { %14 = vsyncpa [#allocation5 + $0x1], 0  ;;  %s2243_s12 = smov 0   ;;  %s2245_s13 = smov 0  }
   0x5   :  { %s2247_s14 = smov 0   ;;  %s2249_s15 = smov 0  }
   0x6 LB: > { %s2264_s16 = sadd.s32 4294967295, %s2209_s15   ;;  %s1634_s17 = sadd.s32 4294967294, %s2209_s15   ;;  %s2209_s15 = sphi %s2249_s15, %s2553_s15   ;;  %s2205_s14 = sphi %s2247_s14, %s2552_s14   ;;  %s2201_s13 = sphi %s2245_s13, %s2551_s13   ;;  %s2197_s12 = sphi %s2243_s12, %s2550_s12  }
   0x7   : > { %p40_p0 = scmp.ne.s32.totalorder %s2201_s13, %s2197_s12  ;;  %p2534_p1 = scmp.eq.s32.totalorder %s2264_s16, 0 }
   0x8   : > { %p112_p3 = scmp.eq.s32.totalorder %s1634_s17, 1  ;;  %p1635_p5 = scmp.ge.s32.totalorder %s2209_s15, 1 }
   0x9   : > { %p2273_p4 = por %p2534_p1, %p40_p0  ;;  %p119_p7 = scmp.lt.s32.totalorder %s2209_s15, 3 }
   0xa   : > { %p2278_p6 = por %p112_p3, %p40_p0  ;;  %s2211_s21 = smov [#allocation6]  }
   0xb   : > { %s2537_s18 = scalar_select %p2273_p4, 1, 0 }
   0xc   : > { %s2538_s19 = scalar_select %p2278_p6, 1, 0 }
   0xd   : > { %p2283_p8 = pnand %p1635_p5, %p119_p7  ;;  %s131_s22 = sshll.u32 %s2211_s21, 4  ;;  %s2287_s22 = int_to_ptr.vmem [resolvable:$true] %s131_s22 }
   0xe   : > { %s2212_s24 = smov [#allocation8]   ;;  %s2053_s28 = scalar_lea.hbm %s2531_s1, 16384 }
   0xf   : > { %p1798_p9 = pneg %p2283_p8  ;;  %s144_s25 = sshll.u32 %s2212_s24, 4  ;;  %s2298_s25 = int_to_ptr.vmem [resolvable:$true] %s144_s25 }
  0x10   : > { %p2054_p12 = scmp.ne.s32.totalorder %s2531_s1, %s2053_s28  ;;  %p2060_p5 = scmp.lt.u32.totalorder %s2053_s28, %s2531_s1 }
  0x11   : > { %p2294_p11 = pnand %p1798_p9, %p2534_p1 }
  0x13   : > { %p2055_p13 = pneg %p2294_p11 }
  0x15   : > { %p2056_p0 = pnand %p2055_p13, %p2054_p12 }
  0x17   : > { %p2057_p3 = pneg %p2056_p0 }
  0x19   : > { %p2062_p7 = pnand %p2060_p5, %p2057_p3 }
  0x1b   : > { %2065 = shalt.err (!%p2062_p7)
}
  0x1c   : > { %s2066_s6 = scalar_lea.vmem %s2287_s22, 16384  ;;  %p2074_p2 = scmp.lt.s32.totalorder %s2287_s22, %s2287_s22 }
  0x1d   : > { %p2067_p9 = scmp.ne.s32.totalorder %s2287_s22, %s2066_s6  ;;  %p2075_p12 = scmp.lt.s32.totalorder %s2066_s6, %s2066_s6 }
  0x1f   : > { %p2069_p10 = pnand %p2067_p9, %p2055_p13  ;;  %p2076_p0 = por %p2075_p12, %p2074_p2 }
  0x21   : > { %p2070_p1 = pneg %p2069_p10 }
  0x23   : > { %p2077_p6 = pnand %p2076_p0, %p2070_p1 }
  0x25   : > { %2080 = shalt.err (!%p2077_p6)
}
  0x26   : > { %s2213_s7 = smov 128   ;;  %s2214_s8 = smov 8  }
  0x27   : > { %1801 = dma.hbm_to_vmem [thread:$0]  (!%p2294_p11), %s2531_s1, 16384, %s2287_s22, [#allocation7], %s2213_s7, %s2213_s7, %s2214_s8  }
  0x28   : > { %s2081_s21 = scalar_lea.hbm %s2532_s2, 128 }
  0x29   : > { %p2082_p2 = scmp.ne.s32.totalorder %s2532_s2, %s2081_s21  ;;  %p2088_p10 = scmp.lt.u32.totalorder %s2081_s21, %s2532_s2 }
  0x2b   : > { %p2084_p1 = pnand %p2082_p2, %p2055_p13 }
  0x2d   : > { %p2085_p6 = pneg %p2084_p1 }
  0x2f   : > { %p2090_p3 = pnand %p2088_p10, %p2085_p6 }
  0x31   : > { %2093 = shalt.err (!%p2090_p3)
}
  0x32   : > { %s2094_s22 = scalar_lea.vmem %s2298_s25, 128  ;;  %p2102_p12 = scmp.lt.s32.totalorder %s2298_s25, %s2298_s25 }
  0x33   : > { %p2095_p5 = scmp.ne.s32.totalorder %s2298_s25, %s2094_s22  ;;  %p2103_p0 = scmp.lt.s32.totalorder %s2094_s22, %s2094_s22 }
  0x35   : > { %p2097_p7 = pnand %p2095_p5, %p2055_p13  ;;  %p2104_p2 = por %p2103_p0, %p2102_p12 }
  0x37   : > { %p2098_p9 = pneg %p2097_p7 }
  0x39   : > { %p2105_p1 = pnand %p2104_p2, %p2098_p9 }
  0x3b   : > { %2108 = shalt.err (!%p2105_p1)
}
  0x3c   : > { %s2215_s29 = smov 32   ;;  %s2216_s30 = smov 2  }
  0x3d   : > { %1804 = dma.hbm_to_vmem [thread:$0]  (!%p2294_p11), %s2532_s2, 128, %s2298_s25, [#allocation7], %s2215_s29, %s2215_s29, %s2216_s30  }
  0x3e   : > { %s2353_s6 = sadd.s32 1, %s2209_s15   ;;  %s27_s8 = sadd.s32 1, %s2205_s14 }
  0x3f   : > { %s24_s7 = ssub.s32 %s2209_s15, %s2353_s6  ;;  %p34_p6 = scmp.ne.s32.totalorder %s2205_s14, %s2201_s13 }
  0x40   : > { %p25_p13 = scmp.eq.s32.totalorder %s24_s7, 0  ;;  %p35_p10 = scmp.eq.s32.totalorder %s2209_s15, 0 }
  0x41   : > { %p2541_p5 = scmp.eq.s32.totalorder %s2264_s16, 1  ;;  %p1815_p9 = scmp.lt.s32.totalorder %s2209_s15, 2 }
  0x42   : > { %s2362_s9 = scalar_select %p25_p13, %s2205_s14, %s27_s8  }
  0x43   : > { %p36_p3 = por %p35_p10, %p34_p6  ;;  %p2366_p7 = por %p2541_p5, %p34_p6 }
  0x44   : > { %s158_s23 = sand.u32 1, %s2205_s14   ;;  %s1783_s25 = sshll.u32 %s2209_s15, 11 }
  0x45   : > { %s2542_s10 = scalar_select %p2366_p7, 1, 0 }
  0x46   : > { %s1639_s11 = sshll.u32 %s158_s23, 7  ;;  %s2376_s24 = scalar_lea.hbm %s2530_s0, %s1783_s25 }
  0x47   : > { %s162_s26 = scalar_lea.vmem [#allocation3], %s1639_s11  ;;  %p2380_p11 = pnand %p1815_p9, %p36_p3 }
  0x48   : > { %s170_s27 = sshll.u32 %s162_s26, 4  ;;  %s2384_s22 = scalar_lea.sflag [#allocation4], %s158_s23  ;;  %s2378_s27 = int_to_ptr.vmem [resolvable:$true] %s170_s27 }
  0x49   : > { %s2109_s29 = scalar_lea.hbm %s2376_s24, 2048  ;;  %p2111_p0 = pneg %p2380_p11 }
  0x4a   : > { %p2110_p12 = scmp.ne.s32.totalorder %s2376_s24, %s2109_s29  ;;  %s2114_s5 = scalar_lea.hbm %s2530_s0, 4096 }
  0x4b   : > { %p2115_p13 = scmp.lt.u32.totalorder %s2376_s24, %s2530_s0  ;;  %p2116_p6 = scmp.lt.u32.totalorder %s2114_s5, %s2109_s29 }
  0x4c   : > { %p2112_p2 = pnand %p2111_p0, %p2110_p12  ;;  %p2118_p3 = scmp.lt.u32.totalorder %s2109_s29, %s2376_s24 }
  0x4d   : > { %p2117_p10 = por %p2116_p6, %p2115_p13 }
  0x4e   : > { %p2113_p1 = pneg %p2112_p2 }
  0x4f   : > { %p2119_p5 = por %p2118_p3, %p2117_p10 }
  0x51   : > { %p2120_p9 = pnand %p2119_p5, %p2113_p1 }
  0x53   : > { %2123 = shalt.err (!%p2120_p9)
}
  0x54   : > { %s2124_s23 = scalar_lea.vmem %s2378_s27, 2048  ;;  %s2217_s11 = smov [#allocation3]  }
  0x55   : > { %p2125_p12 = scmp.ne.s32.totalorder %s2378_s27, %s2124_s23  ;;  %s2129_s25 = sshll.u32 %s2217_s11, 4  ;;  %s2130_s25 = int_to_ptr.vmem [resolvable:$false] %s2129_s25 }
  0x56   : > { %s2131_s17 = scalar_lea.vmem %s2130_s25, 4096  ;;  %p2132_p4 = scmp.lt.s32.totalorder %s2378_s27, %s2130_s25 }
  0x57   : > { %p2127_p2 = pnand %p2125_p12, %p2111_p0  ;;  %p2133_p13 = scmp.lt.s32.totalorder %s2131_s17, %s2124_s23 }
  0x59   : > { %p2128_p7 = pneg %p2127_p2  ;;  %p2134_p6 = por %p2133_p13, %p2132_p4 }
  0x5b   : > { %p2135_p10 = pnand %p2134_p6, %p2128_p7 }
  0x5d   : > { %2138 = shalt.err (!%p2135_p10)
}
  0x5e   : > { %s2218_s21 = smov 256   ;;  %s2219_s26 = smov 16  }
  0x5f   : > { %1808 = dma.hbm_to_vmem [thread:$0]  (!%p2380_p11), %s2376_s24, 2048, %s2378_s27, %s2384_s22, %s2218_s21, %s2218_s21, %s2219_s26  }
  0x60   : > { %182 = sbr.rel (%p2283_p8) target bundleno = 1096 (0x448), region = 32  ;;  %s2415_s29 = sand.u32 (!%p2283_p8), 1, %s2201_s13  }
  0x61   : > { %s1644_s30 = sshll.u32 (!%p2283_p8), %s2415_s29, 7  ;;  %s185_s4 = scalar_lea.sflag (!%p2283_p8), [#allocation4], %s2415_s29 }
  0x62   : > { %s2421_s5 = scalar_lea.vmem (!%p2283_p8), [#allocation3], %s1644_s30  ;;  %p2544_p4 = scmp.ne.s32.totalorder (!%p2283_p8), %s2537_s18, 0 }
  0x67   : > { %2184 = dma.done.wait (%p2544_p4), %s185_s4, 2048  }
  0x68   : > { %2186 = vsyncadd (%p2544_p4), %s185_s4, 4294965248  ;;  %p2545_p7 = scmp.eq.s32.totalorder %s2264_s16, 0 }
  0x6a   : > { %2188 = dma.done.wait (%p2545_p7), [#allocation7], 16512   ;;  %p2546_p8 = pmov %p2545_p7 }
  0x6b   : > { %v1861_v0 = vld [vmem:[#allocation6 + $0x4] ss:$8 sps:$4 sm:$0xff]   ;;  %v1863_v1 = vld [vmem:[#allocation6] ss:$8 sps:$4 sm:$0xff]   ;;  %v1864_v2 = vld [vmem:[#allocation6 + $0x14] ss:$8 sps:$4 sm:$0xff]  }
  0x6c   : > { %2190 = vsyncadd (%p2546_p8), [#allocation7], 4294950784  ;;  %465 = vmatprep.subr.bf16.mxu0 %v1861_v0  ;;  %v1866_v3 = vld [vmem:[#allocation6 + $0x10] ss:$8 sps:$4 sm:$0xff]   ;;  %v1867_v4 = vld [vmem:[#allocation6 + $0x24] ss:$8 sps:$4 sm:$0xff]  }
  0x6d   : > { %466 = vmatpush1.bf16.msra.mxu0 %v1863_v1  ;;  %v1869_v5 = vld [vmem:[#allocation6 + $0x20] ss:$8 sps:$4 sm:$0xff]   ;;  %v1870_v6 = vld [vmem:[#allocation6 + $0x34] ss:$8 sps:$4 sm:$0xff]   ;;  %v1872_v7 = vld [vmem:[#allocation6 + $0x30] ss:$8 sps:$4 sm:$0xff]  }
  0x6e   : > { %467 = vmatprep.subr.bf16.mxu0 %v1864_v2  ;;  %v1873_v8 = vld [vmem:[#allocation6 + $0x44] ss:$8 sps:$4 sm:$0xff]   ;;  %v1875_v9 = vld [vmem:[#allocation6 + $0x40] ss:$8 sps:$4 sm:$0xff]   ;;  %v1876_v10 = vld [vmem:[#allocation6 + $0x54] ss:$8 sps:$4 sm:$0xff]  }
  0x6f   : > { %v1878_v11 = vld [vmem:[#allocation6 + $0x50] ss:$8 sps:$4 sm:$0xff]   ;;  %v1879_v12 = vld [vmem:[#allocation6 + $0x64] ss:$8 sps:$4 sm:$0xff]   ;;  %v1881_v16 = vld [vmem:[#allocation6 + $0x60] ss:$8 sps:$4 sm:$0xff]  }
  0x70   : > { %v222_v13 = vld [vmem:[%s2421_s5 + $0x8] sm:$0xff]  ;;  %v224_v14 = vld [vmem:[%s2421_s5 + $0x18] sm:$0xff]  ;;  %v221_v53 = vld [vmem:[%s2421_s5] sm:$0xff]  ;;  %s2461_s18 = scalar_lea.vmem [#allocation9], %s1644_s30  ;;  %s1785_s20 = sshll.u32 %s2264_s16, 11 }
  0x71   : > { %468 = vmatpush1.bf16.msra.mxu0 %v1866_v3  ;;  %v238_v15 = vpack.c.bf16 %v224_v14, %v222_v13  ;;  %v1882_v17 = vld [vmem:[#allocation6 + $0x74] ss:$8 sps:$4 sm:$0xff]   ;;  %v1884_v18 = vld [vmem:[#allocation6 + $0x70] ss:$8 sps:$4 sm:$0xff]   ;;  %v1885_v19 = vld [vmem:[#allocation6 + $0x84] ss:$8 sps:$4 sm:$0xff]   ;;  %s2481_s22 = scalar_lea.hbm %s2533_s3, %s1785_s20 }
  0x72   : > { %469 = vmatprep.subr.bf16.mxu0 %v1867_v4  ;;  %v1909_v20 = vld [vmem:[#allocation6 + $0x104] ss:$8 sps:$4 sm:$0xff]   ;;  %v1911_v21 = vld [vmem:[#allocation6 + $0x100] ss:$8 sps:$4 sm:$0xff]   ;;  %v1912_v22 = vld [vmem:[#allocation6 + $0x114] ss:$8 sps:$4 sm:$0xff]  }
  0x73   : > { %497 = vmatprep.mubr.bf16.mxu0 %v238_v15  ;;  %784 = vmatprep.subr.bf16.mxu1 %v1909_v20  ;;  %v1914_v23 = vld [vmem:[#allocation6 + $0x110] ss:$8 sps:$4 sm:$0xff]   ;;  %v1887_v24 = vld [vmem:[#allocation6 + $0x80] ss:$8 sps:$4 sm:$0xff]   ;;  %v1915_v25 = vld [vmem:[#allocation6 + $0x124] ss:$8 sps:$4 sm:$0xff]  }
  0x74   : > { %785 = vmatpush1.bf16.msra.mxu1 %v1911_v21  ;;  %v1888_v26 = vld [vmem:[#allocation6 + $0x94] ss:$8 sps:$4 sm:$0xff]   ;;  %v1917_v27 = vld [vmem:[#allocation6 + $0x120] ss:$8 sps:$4 sm:$0xff]   ;;  %v1890_v28 = vld [vmem:[#allocation6 + $0x90] ss:$8 sps:$4 sm:$0xff]  }
  0x75   : > { %470 = vmatpush1.bf16.msra.mxu0 %v1869_v5  ;;  %786 = vmatprep.subr.bf16.mxu1 %v1912_v22  ;;  %v1918_v29 = vld [vmem:[#allocation6 + $0x134] ss:$8 sps:$4 sm:$0xff]   ;;  %v1891_v30 = vld [vmem:[#allocation6 + $0xa4] ss:$8 sps:$4 sm:$0xff]   ;;  %v1920_v31 = vld [vmem:[#allocation6 + $0x130] ss:$8 sps:$4 sm:$0xff]  }
  0x76   : > { %471 = vmatprep.subr.bf16.mxu0 %v1870_v6  ;;  %v1893_v32 = vld [vmem:[#allocation6 + $0xa0] ss:$8 sps:$4 sm:$0xff]   ;;  %v1921_v33 = vld [vmem:[#allocation6 + $0x144] ss:$8 sps:$4 sm:$0xff]   ;;  %v1894_v34 = vld [vmem:[#allocation6 + $0xb4] ss:$8 sps:$4 sm:$0xff]  }
  0x77   : > { %v1896_v35 = vld [vmem:[#allocation6 + $0xb0] ss:$8 sps:$4 sm:$0xff]   ;;  %v1923_v36 = vld [vmem:[#allocation6 + $0x140] ss:$8 sps:$4 sm:$0xff]   ;;  %v1897_v37 = vld [vmem:[#allocation6 + $0xc4] ss:$8 sps:$4 sm:$0xff]  }
  0x78   : > { %787 = vmatpush1.bf16.msra.mxu1 %v1914_v23  ;;  %v1924_v38 = vld [vmem:[#allocation6 + $0x154] ss:$8 sps:$4 sm:$0xff]   ;;  %v1926_v39 = vld [vmem:[#allocation6 + $0x150] ss:$8 sps:$4 sm:$0xff]   ;;  %v1899_v40 = vld [vmem:[#allocation6 + $0xc0] ss:$8 sps:$4 sm:$0xff]  }
  0x79   : > { %472 = vmatpush1.bf16.msra.mxu0 %v1872_v7  ;;  %788 = vmatprep.subr.bf16.mxu1 %v1915_v25  ;;  %v1927_v41 = vld [vmem:[#allocation6 + $0x164] ss:$8 sps:$4 sm:$0xff]   ;;  %v1900_v42 = vld [vmem:[#allocation6 + $0xd4] ss:$8 sps:$4 sm:$0xff]   ;;  %v1929_v43 = vld [vmem:[#allocation6 + $0x160] ss:$8 sps:$4 sm:$0xff]  }
  0x7a   : > { %473 = vmatprep.subr.bf16.mxu0 %v1873_v8  ;;  %v1902_v44 = vld [vmem:[#allocation6 + $0xd0] ss:$8 sps:$4 sm:$0xff]   ;;  %v1930_v45 = vld [vmem:[#allocation6 + $0x174] ss:$8 sps:$4 sm:$0xff]   ;;  %v1903_v46 = vld [vmem:[#allocation6 + $0xe4] ss:$8 sps:$4 sm:$0xff]  }
  0x7b   : > { %v1932_v47 = vld [vmem:[#allocation6 + $0x170] ss:$8 sps:$4 sm:$0xff]   ;;  %v1905_v48 = vld [vmem:[#allocation6 + $0xe0] ss:$8 sps:$4 sm:$0xff]   ;;  %v1933_v49 = vld [vmem:[#allocation6 + $0x184] ss:$8 sps:$4 sm:$0xff]  }
  0x7c   : > { %789 = vmatpush1.bf16.msra.mxu1 %v1917_v27  ;;  %v1906_v50 = vld [vmem:[#allocation6 + $0xf4] ss:$8 sps:$4 sm:$0xff]   ;;  %v1935_v51 = vld [vmem:[#allocation6 + $0x180] ss:$8 sps:$4 sm:$0xff]   ;;  %v1908_v52 = vld [vmem:[#allocation6 + $0xf0] ss:$8 sps:$4 sm:$0xff]  }
  0x7d   : > { %474 = vmatpush1.bf16.msra.mxu0 %v1875_v9  ;;  %790 = vmatprep.subr.bf16.mxu1 %v1918_v29  ;;  %v223_v54 = vld [vmem:[%s2421_s5 + $0x10] sm:$0xff]  ;;  %v226_v56 = vld [vmem:[%s2421_s5 + $0x28] sm:$0xff]  ;;  %v228_v57 = vld [vmem:[%s2421_s5 + $0x38] sm:$0xff]  ;;  %s1542_s24 = sshll.u32 %s2461_s18, 4  ;;  %s1528_s16 = scalar_lea.sflag [#allocation5], %s2415_s29  ;;  %s2483_s24 = int_to_ptr.vmem [resolvable:$true] %s1542_s24 }
  0x7e   : > { %475 = vmatprep.subr.bf16.mxu0 %v1876_v10  ;;  %v1936_v55 = vld [vmem:[#allocation6 + $0x194] ss:$8 sps:$4 sm:$0xff]   ;;  %v1938_v58 = vld [vmem:[#allocation6 + $0x190] ss:$8 sps:$4 sm:$0xff]   ;;  %v1939_v59 = vld [vmem:[#allocation6 + $0x1a4] ss:$8 sps:$4 sm:$0xff]   ;;  %v237_v60 = vpack.c.bf16 %v223_v54, %v221_v53  ;;  %v240_v61 = vpack.c.bf16 %v228_v57, %v226_v56 }
  0x7f   : > { %v1941_v62 = vld [vmem:[#allocation6 + $0x1a0] ss:$8 sps:$4 sm:$0xff]   ;;  %v227_v0 = vld [vmem:[%s2421_s5 + $0x30] sm:$0xff]  ;;  %v232_v3 = vld [vmem:[%s2421_s5 + $0x58] sm:$0xff]  ;;  %s2139_s7 = scalar_lea.vmem %s2483_s24, 2048  ;;  %p2547_p0 = scmp.ne.s32.totalorder %s2542_s10, 0 }
  0x80   : > { %791 = vmatpush1.bf16.msra.mxu1 %v1920_v31  ;;  %v225_v63 = vld [vmem:[%s2421_s5 + $0x20] sm:$0xff]  ;;  %v1942_v1 = vld [vmem:[#allocation6 + $0x1b4] ss:$8 sps:$4 sm:$0xff]   ;;  %v230_v2 = vld [vmem:[%s2421_s5 + $0x48] sm:$0xff]  ;;  %p2140_p11 = scmp.ne.s32.totalorder %s2483_s24, %s2139_s7  ;;  %s2220_s8 = smov [#allocation9]  }
  0x81   : > { %476 = vmatpush1.bf16.msra.mxu0 %v1878_v11  ;;  %792 = vmatprep.subr.bf16.mxu1 %v1921_v33  ;;  %v239_v4 = vpack.c.bf16 %v227_v0, %v225_v63  ;;  %v1944_v5 = vld [vmem:[#allocation6 + $0x1b0] ss:$8 sps:$4 sm:$0xff]   ;;  %v242_v6 = vpack.c.bf16 %v232_v3, %v230_v2  ;;  %v1945_v7 = vld [vmem:[#allocation6 + $0x1c4] ss:$8 sps:$4 sm:$0xff]   ;;  %v1947_v8 = vld [vmem:[#allocation6 + $0x1c0] ss:$8 sps:$4 sm:$0xff]  }
  0x82   : > { %477 = vmatprep.subr.bf16.mxu0 %v1879_v12  ;;  %v229_v9 = vld [vmem:[%s2421_s5 + $0x40] sm:$0xff]  ;;  %v231_v10 = vld [vmem:[%s2421_s5 + $0x50] sm:$0xff]  ;;  %v234_v12 = vld [vmem:[%s2421_s5 + $0x68] sm:$0xff]  ;;  %p2141_p1 = pnand %p2140_p11, %p2547_p0  ;;  %s2143_s23 = sshll.u32 %s2220_s8, 4  ;;  %s2144_s23 = int_to_ptr.vmem [resolvable:$false] %s2143_s23 }
  0x83   : > { %v1948_v11 = vld [vmem:[#allocation6 + $0x1d4] ss:$8 sps:$4 sm:$0xff]   ;;  %v241_v14 = vpack.c.bf16 %v231_v10, %v229_v9  ;;  %v1951_v20 = vld [vmem:[#allocation6 + $0x1e4] ss:$8 sps:$4 sm:$0xff]   ;;  %v1953_v21 = vld [vmem:[#allocation6 + $0x1e0] ss:$8 sps:$4 sm:$0xff]   ;;  %p2146_p5 = scmp.lt.s32.totalorder %s2483_s24, %s2144_s23 }
  0x84   : > { %793 = vmatpush1.bf16.msra.mxu1 %v1923_v36  ;;  %v236_v13 = vld [vmem:[%s2421_s5 + $0x78] sm:$0xff]  ;;  %v1959_v25 = vld [vmem:[#allocation6 + $0x204] ss:$8 sps:$4 sm:$0xff]   ;;  %v1963_v29 = vld [vmem:[#allocation6 + $0x220] ss:$8 sps:$4 sm:$0xff]   ;;  %p2142_p3 = pneg %p2141_p1  ;;  %s2145_s11 = scalar_lea.vmem %s2144_s23, 4096 }
  0x85   : > { %478 = vmatpush1.bf16.msra.mxu0 %v1881_v16  ;;  %794 = vmatprep.subr.bf16.mxu1 %v1924_v38  ;;  %v244_v15 = vpack.c.bf16 %v236_v13, %v234_v12  ;;  %v233_v16 = vld [vmem:[%s2421_s5 + $0x60] sm:$0xff]  ;;  %v1954_v22 = vld [vmem:[#allocation6 + $0x1f4] ss:$8 sps:$4 sm:$0xff]   ;;  %v1956_v23 = vld [vmem:[#allocation6 + $0x1f0] ss:$8 sps:$4 sm:$0xff]   ;;  %p2147_p9 = scmp.lt.s32.totalorder %s2145_s11, %s2139_s7 }
  0x86   : > { %479 = vmatprep.subr.bf16.mxu0 %v1882_v17  ;;  %v235_v17 = vld [vmem:[%s2421_s5 + $0x70] sm:$0xff]  ;;  %v1969_v33 = vld [vmem:[#allocation6 + $0x240] ss:$8 sps:$4 sm:$0xff]   ;;  %v1977_v36 = vld [vmem:[#allocation6 + $0x264] ss:$8 sps:$4 sm:$0xff]  }
  0x87   : > { %v1960_v27 = vld [vmem:[#allocation6 + $0x210] ss:$8 sps:$4 sm:$0xff]   ;;  %v1980_v38 = vld [vmem:[#allocation6 + $0x274] ss:$8 sps:$4 sm:$0xff]   ;;  %p2148_p12 = por %p2147_p9, %p2146_p5 }
  0x88   : > { %795 = vmatpush1.bf16.msra.mxu1 %v1926_v39  ;;  %v1966_v31 = vld [vmem:[#allocation6 + $0x230] ss:$8 sps:$4 sm:$0xff]  }
  0x89   : > { %480 = vmatpush1.bf16.msra.mxu0 %v1884_v18  ;;  %796 = vmatprep.subr.bf16.mxu1 %v1927_v41  ;;  %v243_v18 = vpack.c.bf16 %v235_v17, %v233_v16  ;;  %v1978_v39 = vld [vmem:[#allocation6 + $0x270] ss:$8 sps:$4 sm:$0xff]   ;;  %v1981_v41 = vld [vmem:[#allocation6 + $0x280] ss:$8 sps:$4 sm:$0xff]   ;;  %p2149_p2 = pnand %p2148_p12, %p2142_p3 }
  0x8a   : > { %481 = vmatprep.subr.bf16.mxu0 %v1885_v19  ;;  %v1950_v19 = vld [vmem:[#allocation6 + $0x1d0] ss:$8 sps:$4 sm:$0xff]  }
  0x8c   : > { %797 = vmatpush1.bf16.msra.mxu1 %v1929_v43  ;;  %v1984_v43 = vld [vmem:[#allocation6 + $0x290] ss:$8 sps:$4 sm:$0xff]  }
  0x8d   : > { %482 = vmatpush1.bf16.msra.mxu0 %v1887_v24  ;;  %798 = vmatprep.subr.bf16.mxu1 %v1930_v45  ;;  %v1957_v24 = vld [vmem:[#allocation6 + $0x200] ss:$8 sps:$4 sm:$0xff]  }
  0x8e   : > { %483 = vmatprep.subr.bf16.mxu0 %v1888_v26  ;;  %v1962_v26 = vld [vmem:[#allocation6 + $0x214] ss:$8 sps:$4 sm:$0xff]   ;;  %v1987_v45 = vld [vmem:[#allocation6 + $0x2a0] ss:$8 sps:$4 sm:$0xff]  }
  0x90   : > { %799 = vmatpush1.bf16.msra.mxu1 %v1932_v47  ;;  %v1990_v47 = vld [vmem:[#allocation6 + $0x2b0] ss:$8 sps:$4 sm:$0xff]  }
  0x91   : > { %484 = vmatpush1.bf16.msra.mxu0 %v1890_v28  ;;  %800 = vmatprep.subr.bf16.mxu1 %v1933_v49  ;;  %v1965_v28 = vld [vmem:[#allocation6 + $0x224] ss:$8 sps:$4 sm:$0xff]   ;;  %v1993_v49 = vld [vmem:[#allocation6 + $0x2c0] ss:$8 sps:$4 sm:$0xff]  }
  0x92   : > { %485 = vmatprep.subr.bf16.mxu0 %v1891_v30  ;;  %v1968_v30 = vld [vmem:[#allocation6 + $0x234] ss:$8 sps:$4 sm:$0xff]  }
  0x94   : > { %801 = vmatpush1.bf16.msra.mxu1 %v1935_v51  ;;  %v1996_v51 = vld [vmem:[#allocation6 + $0x2d0] ss:$8 sps:$4 sm:$0xff]  }
  0x95   : > { %486 = vmatpush1.bf16.msra.mxu0 %v1893_v32  ;;  %802 = vmatprep.subr.bf16.mxu1 %v1936_v55  ;;  %v1971_v32 = vld [vmem:[#allocation6 + $0x244] ss:$8 sps:$4 sm:$0xff]   ;;  %v293_v55 = vld [vmem:[#allocation8] sm:$0x3] }
  0x96   : > { %487 = vmatprep.subr.bf16.mxu0 %v1894_v34  ;;  %v1974_v34 = vld [vmem:[#allocation6 + $0x254] ss:$8 sps:$4 sm:$0xff]  }
  0x98   : > { %803 = vmatpush1.bf16.msra.mxu1 %v1938_v58 }
  0x99   : > { %488 = vmatpush1.bf16.msra.mxu0 %v1896_v35  ;;  %804 = vmatprep.subr.bf16.mxu1 %v1939_v59  ;;  %v1972_v35 = vld [vmem:[#allocation6 + $0x250] ss:$8 sps:$4 sm:$0xff]  }
  0x9a   : > { %489 = vmatprep.subr.bf16.mxu0 %v1897_v37  ;;  %v1975_v37 = vld [vmem:[#allocation6 + $0x260] ss:$8 sps:$4 sm:$0xff]  }
  0x9c   : > { %805 = vmatpush1.bf16.msra.mxu1 %v1941_v62 }
  0x9d   : > { %490 = vmatpush1.bf16.msra.mxu0 %v1899_v40  ;;  %806 = vmatprep.subr.bf16.mxu1 %v1942_v1  ;;  %v1983_v40 = vld [vmem:[#allocation6 + $0x284] ss:$8 sps:$4 sm:$0xff]  }
  0x9e   : > { %491 = vmatprep.subr.bf16.mxu0 %v1900_v42  ;;  %v1986_v42 = vld [vmem:[#allocation6 + $0x294] ss:$8 sps:$4 sm:$0xff]  }
  0xa0   : > { %807 = vmatpush1.bf16.msra.mxu1 %v1944_v5 }
  0xa1   : > { %492 = vmatpush1.bf16.msra.mxu0 %v1902_v44  ;;  %808 = vmatprep.subr.bf16.mxu1 %v1945_v7  ;;  %v1989_v44 = vld [vmem:[#allocation6 + $0x2a4] ss:$8 sps:$4 sm:$0xff]  }
  0xa2   : > { %493 = vmatprep.subr.bf16.mxu0 %v1903_v46  ;;  %v1992_v46 = vld [vmem:[#allocation6 + $0x2b4] ss:$8 sps:$4 sm:$0xff]  }
  0xa4   : > { %809 = vmatpush1.bf16.msra.mxu1 %v1947_v8 }
  0xa5   : > { %494 = vmatpush1.bf16.msra.mxu0 %v1905_v48  ;;  %810 = vmatprep.subr.bf16.mxu1 %v1948_v11  ;;  %v1995_v48 = vld [vmem:[#allocation6 + $0x2c4] ss:$8 sps:$4 sm:$0xff]  }
  0xa6   : > { %495 = vmatprep.subr.bf16.mxu0 %v1906_v50  ;;  %v1998_v50 = vld [vmem:[#allocation6 + $0x2d4] ss:$8 sps:$4 sm:$0xff]  }
  0xa8   : > { %811 = vmatpush1.bf16.msra.mxu1 %v1950_v19 }
  0xa9   : > { %496 = vmatpush1.bf16.msra.mxu0 %v1908_v52  ;;  %812 = vmatprep.subr.bf16.mxu1 %v1951_v20  ;;  %v295_v52 = vlaneseq }
  0xaa   : > { %1103 = vmatprep.subr.bf16.mxu0 %v1959_v25 }
  0xab   : > { %v296_v53 = vshrl.u32 %v295_v52, 7  ;;  %v1999_v52 = vld [vmem:[#allocation6 + $0x2e0] ss:$8 sps:$4 sm:$0xff]  }
  0xac   : > { %498 = vmatmul.mubr.bf16.vlgmr.msra.gmra.mrb[0].mxu0 %v237_v60  ;;  %813 = vmatpush1.bf16.msra.mxu1 %v1953_v21 }
  0xad   : > { %507 = vmatprep.mubr.bf16.mxu0 %v240_v61  ;;  %814 = vmatprep.subr.bf16.mxu1 %v1954_v22  ;;  %v2447_v54 = vsub.s32 0, %v296_v53  ;;  %v2449_v56 = vsub.s32 1, %v296_v53  ;;  %v2004_v53 = vld [vmem:[#allocation6 + $0x2f4] ss:$8 sps:$4 sm:$0xff]  }
  0xae   : > { %1104 = vmatpush1.bf16.msra.mxu0 %v1957_v24 }
  0xaf   : > { %1105 = vmatprep.subr.bf16.mxu0 %v1962_v26  ;;  %v298_v57 = vrot.slane %v293_v55, %v2447_v54  ;;  %v302_v58 = vrot.slane %v293_v55, %v2449_v56  ;;  %v2002_v55 = vld [vmem:[#allocation6 + $0x2f0] ss:$8 sps:$4 sm:$0xff]  }
  0xb0   : > { %815 = vmatpush1.bf16.msra.mxu1 %v1956_v23 }
  0xb2   : > { %1106 = vmatpush1.bf16.msra.mxu0 %v1960_v27 }
  0xb3   : > { %1107 = vmatprep.subr.bf16.mxu0 %v1965_v28 }
  0xb4   : > { %508 = vmatmul.mubr.bf16.gmra.mrb[4].mxu0 %v239_v4 }
  0xb5   : > { %517 = vmatprep.mubr.bf16.mxu0 %v242_v6 }
  0xb6   : > { %1108 = vmatpush1.bf16.msra.mxu0 %v1963_v29 }
  0xb7   : > { %1109 = vmatprep.subr.bf16.mxu0 %v1968_v30 }
  0xba   : > { %1110 = vmatpush1.bf16.msra.mxu0 %v1966_v31 }
  0xbb   : > { %1111 = vmatprep.subr.bf16.mxu0 %v1971_v32 }
  0xbc   : > { %518 = vmatmul.mubr.bf16.gmra.mrb[8].mxu0 %v241_v14 }
  0xbd   : > { %527 = vmatprep.mubr.bf16.mxu0 %v244_v15 }
  0xbe   : > { %1112 = vmatpush1.bf16.msra.mxu0 %v1969_v33 }
  0xbf   : > { %1113 = vmatprep.subr.bf16.mxu0 %v1974_v34 }
  0xc2   : > { %1114 = vmatpush1.bf16.msra.mxu0 %v1972_v35 }
  0xc3   : > { %1115 = vmatprep.subr.bf16.mxu0 %v1977_v36 }
  0xc4   : > { %528 = vmatmul.mubr.bf16.gmra.mrb[12].mxu0 %v243_v18 }
  0xc6   : > { %1116 = vmatpush1.bf16.msra.mxu0 %v1975_v37 }
  0xc7   : > { %1117 = vmatprep.subr.bf16.mxu0 %v1980_v38 }
  0xca   : > { %1118 = vmatpush1.bf16.msra.mxu0 %v1978_v39 }
  0xcb   : > { %1119 = vmatprep.subr.bf16.mxu0 %v1983_v40 }
  0xce   : > { %1120 = vmatpush1.bf16.msra.mxu0 %v1981_v41 }
  0xcf   : > { %1121 = vmatprep.subr.bf16.mxu0 %v1986_v42 }
  0xd2   : > { %1122 = vmatpush1.bf16.msra.mxu0 %v1984_v43 }
  0xd3   : > { %1123 = vmatprep.subr.bf16.mxu0 %v1989_v44 }
  0xd6   : > { %1124 = vmatpush1.bf16.msra.mxu0 %v1987_v45 }
  0xd7   : > { %1125 = vmatprep.subr.bf16.mxu0 %v1992_v46 }
  0xda   : > { %1126 = vmatpush1.bf16.msra.mxu0 %v1990_v47 }
  0xdb   : > { %1127 = vmatprep.subr.bf16.mxu0 %v1995_v48 }
  0xde   : > { %1128 = vmatpush1.bf16.msra.mxu0 %v1993_v49 }
  0xdf   : > { %1129 = vmatprep.subr.bf16.mxu0 %v1998_v50 }
  0xe2   : > { %1130 = vmatpush1.bf16.msra.mxu0 %v1996_v51  ;;  %v2001_v51 = vld [vmem:[#allocation6 + $0x2e4] ss:$8 sps:$4 sm:$0xff]  }
  0xe3   : > { %1131 = vmatprep.subr.bf16.mxu0 %v2001_v51 }
  0xe6   : > { %1132 = vmatpush1.bf16.msra.mxu0 %v1999_v52 }
  0xe7   : > { %1133 = vmatprep.subr.bf16.mxu0 %v2004_v53 }
  0xea   : > { %1134 = vmatpush1.bf16.msra.mxu0 %v2002_v55 }
 0x17f   : > { %v499_v59 = vpop.f32.mrb[0].mxu0 }
 0x180   : > { %v500_v60 = vadd.f32 %v499_v59, %v298_v57  ;;  %v501_v61 = vpop.f32.mrb[1].mxu0  ;;  %v2007_v59 = vld [vmem:[#allocation6 + $0x304] ss:$8 sps:$4 sm:$0xff]  }
 0x181   : > { %v502_v62 = vadd.f32 %v501_v61, %v302_v58  ;;  %v503_v63 = vpop.f32.mrb[2].mxu0  ;;  %1422 = vmatprep.subr.bf16.mxu1 %v2007_v59  ;;  %v2013_v61 = vld [vmem:[#allocation6 + $0x324] ss:$8 sps:$4 sm:$0xff]  }
 0x182   : > { %v504_v0 = vadd.f32 %v503_v63, %v298_v57  ;;  %v505_v1 = vpop.f32.mrb[3].mxu0  ;;  %v538_v3 = vmax.f32 %v500_v60, 0.0  ;;  %v2010_v60 = vld [vmem:[#allocation6 + $0x314] ss:$8 sps:$4 sm:$0xff]  }
 0x183   : > { %v506_v2 = vadd.f32 %v505_v1, %v302_v58  ;;  %v539_v5 = vmax.f32 %v502_v62, 0.0  ;;  %v2011_v62 = vld [vmem:[#allocation6 + $0x320] ss:$8 sps:$4 sm:$0xff]   ;;  %v2016_v63 = vld [vmem:[#allocation6 + $0x334] ss:$8 sps:$4 sm:$0xff]  }
 0x184   : > { %v540_v4 = vmax.f32 %v504_v0, 0.0  ;;  %v2014_v0 = vld [vmem:[#allocation6 + $0x330] ss:$8 sps:$4 sm:$0xff]   ;;  %v2019_v1 = vld [vmem:[#allocation6 + $0x344] ss:$8 sps:$4 sm:$0xff]  }
 0x185   : > { %v541_v6 = vmax.f32 %v506_v2, 0.0  ;;  %v2017_v2 = vld [vmem:[#allocation6 + $0x340] ss:$8 sps:$4 sm:$0xff]  }
 0x186   : > { %v554_v7 = vpack.c.bf16 %v540_v4, %v538_v3  ;;  %v2022_v3 = vld [vmem:[#allocation6 + $0x354] ss:$8 sps:$4 sm:$0xff]   ;;  %v2020_v4 = vld [vmem:[#allocation6 + $0x350] ss:$8 sps:$4 sm:$0xff]  }
 0x187   : > { %v509_v8 = vpop.f32.mrb[4].mxu0  ;;  %v555_v9 = vpack.c.bf16 %v541_v6, %v539_v5  ;;  %v2025_v5 = vld [vmem:[#allocation6 + $0x364] ss:$8 sps:$4 sm:$0xff]   ;;  %v2023_v6 = vld [vmem:[#allocation6 + $0x360] ss:$8 sps:$4 sm:$0xff]  }
 0x188   : > { %v510_v10 = vadd.f32 %v509_v8, %v298_v57  ;;  %v511_v11 = vpop.f32.mrb[5].mxu0  ;;  %v2026_v8 = vld [vmem:[#allocation6 + $0x370] ss:$8 sps:$4 sm:$0xff]  }
 0x189   : > { %v512_v12 = vadd.f32 %v511_v11, %v302_v58  ;;  %v513_v13 = vpop.f32.mrb[6].mxu0  ;;  %816 = vmatprep.mubr.bf16.mxu1 %v555_v9  ;;  %v2031_v9 = vld [vmem:[#allocation6 + $0x384] ss:$8 sps:$4 sm:$0xff]   ;;  %v2034_v11 = vld [vmem:[#allocation6 + $0x394] ss:$8 sps:$4 sm:$0xff]  }
 0x18a   : > { %v514_v14 = vadd.f32 %v513_v13, %v298_v57  ;;  %v515_v15 = vpop.f32.mrb[7].mxu0  ;;  %817 = vmatmul.mubr.bf16.vlgmr.msra.gmra.mrb[0].mxu1 %v554_v7  ;;  %v542_v17 = vmax.f32 %v510_v10, 0.0  ;;  %v2028_v7 = vld [vmem:[#allocation6 + $0x374] ss:$8 sps:$4 sm:$0xff]   ;;  %v2029_v10 = vld [vmem:[#allocation6 + $0x380] ss:$8 sps:$4 sm:$0xff]  }
 0x18b   : > { %v516_v16 = vadd.f32 %v515_v15, %v302_v58  ;;  %v543_v19 = vmax.f32 %v512_v12, 0.0  ;;  %v2032_v12 = vld [vmem:[#allocation6 + $0x390] ss:$8 sps:$4 sm:$0xff]   ;;  %v2037_v13 = vld [vmem:[#allocation6 + $0x3a4] ss:$8 sps:$4 sm:$0xff]  }
 0x18c   : > { %v544_v18 = vmax.f32 %v514_v14, 0.0  ;;  %v2035_v14 = vld [vmem:[#allocation6 + $0x3a0] ss:$8 sps:$4 sm:$0xff]   ;;  %v2040_v15 = vld [vmem:[#allocation6 + $0x3b4] ss:$8 sps:$4 sm:$0xff]  }
 0x18d   : > { %v545_v20 = vmax.f32 %v516_v16, 0.0  ;;  %v2038_v16 = vld [vmem:[#allocation6 + $0x3b0] ss:$8 sps:$4 sm:$0xff]  }
 0x18e   : > { %v556_v21 = vpack.c.bf16 %v544_v18, %v542_v17  ;;  %v2043_v17 = vld [vmem:[#allocation6 + $0x3c4] ss:$8 sps:$4 sm:$0xff]   ;;  %v2041_v18 = vld [vmem:[#allocation6 + $0x3c0] ss:$8 sps:$4 sm:$0xff]  }
 0x18f   : > { %v557_v22 = vpack.c.bf16 %v545_v20, %v543_v19  ;;  %v519_v23 = vpop.f32.mrb[8].mxu0  ;;  %v2046_v19 = vld [vmem:[#allocation6 + $0x3d4] ss:$8 sps:$4 sm:$0xff]   ;;  %v2044_v20 = vld [vmem:[#allocation6 + $0x3d0] ss:$8 sps:$4 sm:$0xff]  }
 0x190   : > { %v520_v24 = vadd.f32 %v519_v23, %v298_v57  ;;  %v521_v25 = vpop.f32.mrb[9].mxu0 }
 0x191   : > { %v522_v26 = vadd.f32 %v521_v25, %v302_v58  ;;  %v523_v27 = vpop.f32.mrb[10].mxu0  ;;  %826 = vmatprep.mubr.bf16.mxu1 %v557_v22 }
 0x192   : > { %v524_v28 = vadd.f32 %v523_v27, %v298_v57  ;;  %v525_v29 = vpop.f32.mrb[11].mxu0  ;;  %827 = vmatmul.mubr.bf16.gmra.mrb[4].mxu1 %v556_v21  ;;  %v546_v31 = vmax.f32 %v520_v24, 0.0  ;;  %v612_v21 = vld [vmem:[#allocation8 + $0x2] sm:$0x3] }
 0x193   : > { %v526_v30 = vadd.f32 %v525_v29, %v302_v58  ;;  %v547_v33 = vmax.f32 %v522_v26, 0.0  ;;  %v617_v22 = vrot.slane %v612_v21, %v2447_v54  ;;  %v621_v23 = vrot.slane %v612_v21, %v2449_v56  ;;  %v2050_v21 = vld [vmem:[#allocation6 + $0x3f0] ss:$8 sps:$4 sm:$0xff]  }
 0x194   : > { %v548_v32 = vmax.f32 %v524_v28, 0.0 }
 0x195   : > { %v549_v34 = vmax.f32 %v526_v30, 0.0 }
 0x196   : > { %v558_v35 = vpack.c.bf16 %v548_v32, %v546_v31 }
 0x197   : > { %v559_v36 = vpack.c.bf16 %v549_v34, %v547_v33  ;;  %v529_v37 = vpop.f32.mrb[12].mxu0 }
 0x198   : > { %v530_v38 = vadd.f32 %v529_v37, %v298_v57  ;;  %v531_v39 = vpop.f32.mrb[13].mxu0 }
 0x199   : > { %v532_v40 = vadd.f32 %v531_v39, %v302_v58  ;;  %v533_v41 = vpop.f32.mrb[14].mxu0  ;;  %836 = vmatprep.mubr.bf16.mxu1 %v559_v36 }
 0x19a   : > { %v534_v42 = vadd.f32 %v533_v41, %v298_v57  ;;  %v535_v43 = vpop.f32.mrb[15].mxu0  ;;  %837 = vmatmul.mubr.bf16.gmra.mrb[8].mxu1 %v558_v35  ;;  %v550_v45 = vmax.f32 %v530_v38, 0.0  ;;  %v2005_v57 = vld [vmem:[#allocation6 + $0x300] ss:$8 sps:$4 sm:$0xff]  }
 0x19b   : > { %v536_v44 = vadd.f32 %v535_v43, %v302_v58  ;;  %v551_v47 = vmax.f32 %v532_v40, 0.0  ;;  %1423 = vmatpush1.bf16.msra.mxu1 %v2005_v57  ;;  %v2008_v58 = vld [vmem:[#allocation6 + $0x310] ss:$8 sps:$4 sm:$0xff]  }
 0x19c   : > { %v552_v46 = vmax.f32 %v534_v42, 0.0  ;;  %1424 = vmatprep.subr.bf16.mxu1 %v2010_v60 }
 0x19d   : > { %v553_v48 = vmax.f32 %v536_v44, 0.0 }
 0x19e   : > { %v560_v49 = vpack.c.bf16 %v552_v46, %v550_v45 }
 0x19f   : > { %v561_v50 = vpack.c.bf16 %v553_v48, %v551_v47  ;;  %1425 = vmatpush1.bf16.msra.mxu1 %v2008_v58 }
 0x1a0   : > { %1426 = vmatprep.subr.bf16.mxu1 %v2013_v61 }
 0x1a1   : > { %846 = vmatprep.mubr.bf16.mxu1 %v561_v50 }
 0x1a2   : > { %847 = vmatmul.mubr.bf16.gmra.mrb[12].mxu1 %v560_v49 }
 0x1a3   : > { %1427 = vmatpush1.bf16.msra.mxu1 %v2011_v62 }
 0x1a4   : > { %1428 = vmatprep.subr.bf16.mxu1 %v2016_v63 }
 0x1a7   : > { %1429 = vmatpush1.bf16.msra.mxu1 %v2014_v0 }
 0x1a8   : > { %1430 = vmatprep.subr.bf16.mxu1 %v2019_v1 }
 0x1ab   : > { %1431 = vmatpush1.bf16.msra.mxu1 %v2017_v2 }
 0x1ac   : > { %1432 = vmatprep.subr.bf16.mxu1 %v2022_v3 }
 0x1af   : > { %1433 = vmatpush1.bf16.msra.mxu1 %v2020_v4 }
 0x1b0   : > { %1434 = vmatprep.subr.bf16.mxu1 %v2025_v5 }
 0x1b3   : > { %1435 = vmatpush1.bf16.msra.mxu1 %v2023_v6 }
 0x1b4   : > { %1436 = vmatprep.subr.bf16.mxu1 %v2028_v7 }
 0x1b7   : > { %1437 = vmatpush1.bf16.msra.mxu1 %v2026_v8 }
 0x1b8   : > { %1438 = vmatprep.subr.bf16.mxu1 %v2031_v9 }
 0x1bb   : > { %1439 = vmatpush1.bf16.msra.mxu1 %v2029_v10 }
 0x1bc   : > { %1440 = vmatprep.subr.bf16.mxu1 %v2034_v11 }
 0x1bf   : > { %1441 = vmatpush1.bf16.msra.mxu1 %v2032_v12 }
 0x1c0   : > { %1442 = vmatprep.subr.bf16.mxu1 %v2037_v13 }
 0x1c3   : > { %1443 = vmatpush1.bf16.msra.mxu1 %v2035_v14 }
 0x1c4   : > { %1444 = vmatprep.subr.bf16.mxu1 %v2040_v15 }
 0x1c7   : > { %1445 = vmatpush1.bf16.msra.mxu1 %v2038_v16 }
 0x1c8   : > { %1446 = vmatprep.subr.bf16.mxu1 %v2043_v17 }
 0x1cb   : > { %1447 = vmatpush1.bf16.msra.mxu1 %v2041_v18  ;;  %v2049_v18 = vld [vmem:[#allocation6 + $0x3e4] ss:$8 sps:$4 sm:$0xff]  }
 0x1cc   : > { %1448 = vmatprep.subr.bf16.mxu1 %v2046_v19  ;;  %v2047_v19 = vld [vmem:[#allocation6 + $0x3e0] ss:$8 sps:$4 sm:$0xff]  }
 0x1cf   : > { %1449 = vmatpush1.bf16.msra.mxu1 %v2044_v20  ;;  %v2052_v20 = vld [vmem:[#allocation6 + $0x3f4] ss:$8 sps:$4 sm:$0xff]  }
 0x1d0   : > { %1450 = vmatprep.subr.bf16.mxu1 %v2049_v18 }
 0x1d3   : > { %1451 = vmatpush1.bf16.msra.mxu1 %v2047_v19  ;;  %v1250_v19 = vld [vmem:[#allocation8 + $0x6] sm:$0x3] }
 0x1d4   : > { %1452 = vmatprep.subr.bf16.mxu1 %v2052_v20  ;;  %v1255_v20 = vrot.slane %v1250_v19, %v2447_v54 }
 0x1d7   : > { %1453 = vmatpush1.bf16.msra.mxu1 %v2050_v21  ;;  %v1259_v21 = vrot.slane %v1250_v19, %v2449_v56 }
 0x25d   : > { %v818_v24 = vpop.f32.mrb[0].mxu1 }
 0x25e   : > { %v819_v25 = vadd.f32 %v818_v24, %v617_v22  ;;  %v820_v26 = vpop.f32.mrb[1].mxu1 }
 0x25f   : > { %v821_v27 = vadd.f32 %v820_v26, %v621_v23  ;;  %v822_v28 = vpop.f32.mrb[2].mxu1 }
 0x260   : > { %v823_v29 = vadd.f32 %v822_v28, %v617_v22  ;;  %v824_v30 = vpop.f32.mrb[3].mxu1  ;;  %v857_v32 = vmax.f32 %v819_v25, 0.0 }
 0x261   : > { %v825_v31 = vadd.f32 %v824_v30, %v621_v23  ;;  %v858_v34 = vmax.f32 %v821_v27, 0.0 }
 0x262   : > { %v859_v33 = vmax.f32 %v823_v29, 0.0 }
 0x263   : > { %v860_v35 = vmax.f32 %v825_v31, 0.0 }
 0x264   : > { %v873_v36 = vpack.c.bf16 %v859_v33, %v857_v32 }
 0x265   : > { %v874_v37 = vpack.c.bf16 %v860_v35, %v858_v34  ;;  %v828_v38 = vpop.f32.mrb[4].mxu1 }
 0x266   : > { %v829_v39 = vadd.f32 %v828_v38, %v617_v22  ;;  %v830_v40 = vpop.f32.mrb[5].mxu1 }
 0x267   : > { %v831_v41 = vadd.f32 %v830_v40, %v621_v23  ;;  %v832_v42 = vpop.f32.mrb[6].mxu1  ;;  %1135 = vmatprep.mubr.bf16.mxu0 %v874_v37 }
 0x268   : > { %v833_v43 = vadd.f32 %v832_v42, %v617_v22  ;;  %v834_v44 = vpop.f32.mrb[7].mxu1  ;;  %1136 = vmatmul.mubr.bf16.vlgmr.msra.gmra.mrb[16].mxu0 %v873_v36  ;;  %v861_v46 = vmax.f32 %v829_v39, 0.0 }
 0x269   : > { %v835_v45 = vadd.f32 %v834_v44, %v621_v23  ;;  %v862_v48 = vmax.f32 %v831_v41, 0.0 }
 0x26a   : > { %v863_v47 = vmax.f32 %v833_v43, 0.0 }
 0x26b   : > { %v864_v49 = vmax.f32 %v835_v45, 0.0 }
 0x26c   : > { %v875_v50 = vpack.c.bf16 %v863_v47, %v861_v46 }
 0x26d   : > { %v876_v51 = vpack.c.bf16 %v864_v49, %v862_v48  ;;  %v838_v52 = vpop.f32.mrb[8].mxu1 }
 0x26e   : > { %v839_v53 = vadd.f32 %v838_v52, %v617_v22  ;;  %v840_v55 = vpop.f32.mrb[9].mxu1 }
 0x26f   : > { %v841_v57 = vadd.f32 %v840_v55, %v621_v23  ;;  %v842_v59 = vpop.f32.mrb[10].mxu1  ;;  %1145 = vmatprep.mubr.bf16.mxu0 %v876_v51 }
 0x270   : > { %v843_v60 = vadd.f32 %v842_v59, %v617_v22  ;;  %v844_v58 = vpop.f32.mrb[11].mxu1  ;;  %1146 = vmatmul.mubr.bf16.gmra.mrb[20].mxu0 %v875_v50  ;;  %v865_v62 = vmax.f32 %v839_v53, 0.0 }
 0x271   : > { %v845_v61 = vadd.f32 %v844_v58, %v621_v23  ;;  %v866_v0 = vmax.f32 %v841_v57, 0.0 }
 0x272   : > { %v867_v63 = vmax.f32 %v843_v60, 0.0 }
 0x273   : > { %v868_v1 = vmax.f32 %v845_v61, 0.0 }
 0x274   : > { %v877_v2 = vpack.c.bf16 %v867_v63, %v865_v62 }
 0x275   : > { %v878_v3 = vpack.c.bf16 %v868_v1, %v866_v0  ;;  %v848_v4 = vpop.f32.mrb[12].mxu1 }
 0x276   : > { %v849_v5 = vadd.f32 %v848_v4, %v617_v22  ;;  %v850_v6 = vpop.f32.mrb[13].mxu1 }
 0x277   : > { %v851_v7 = vadd.f32 %v850_v6, %v621_v23  ;;  %v852_v8 = vpop.f32.mrb[14].mxu1  ;;  %1155 = vmatprep.mubr.bf16.mxu0 %v878_v3 }
 0x278   : > { %v853_v9 = vadd.f32 %v852_v8, %v617_v22  ;;  %v854_v10 = vpop.f32.mrb[15].mxu1  ;;  %1156 = vmatmul.mubr.bf16.gmra.mrb[24].mxu0 %v877_v2  ;;  %v869_v12 = vmax.f32 %v849_v5, 0.0  ;;  %v931_v22 = vld [vmem:[#allocation8 + $0x4] sm:$0x3] }
 0x279   : > { %v855_v11 = vadd.f32 %v854_v10, %v621_v23  ;;  %v870_v14 = vmax.f32 %v851_v7, 0.0  ;;  %v936_v24 = vrot.slane %v931_v22, %v2447_v54  ;;  %v940_v23 = vrot.slane %v931_v22, %v2449_v56 }
 0x27a   : > { %v871_v13 = vmax.f32 %v853_v9, 0.0 }
 0x27b   : > { %v872_v15 = vmax.f32 %v855_v11, 0.0 }
 0x27c   : > { %v879_v16 = vpack.c.bf16 %v871_v13, %v869_v12 }
 0x27d   : > { %v880_v17 = vpack.c.bf16 %v872_v15, %v870_v14 }
 0x27f   : > { %1165 = vmatprep.mubr.bf16.mxu0 %v880_v17 }
 0x280   : > { %1166 = vmatmul.mubr.bf16.gmra.mrb[28].mxu0 %v879_v16 }
 0x33b   : > { %v1137_v25 = vpop.f32.mrb[16].mxu0 }
 0x33c   : > { %v1138_v26 = vadd.f32 %v1137_v25, %v936_v24  ;;  %v1139_v27 = vpop.f32.mrb[17].mxu0 }
 0x33d   : > { %v1140_v28 = vadd.f32 %v1139_v27, %v940_v23  ;;  %v1141_v29 = vpop.f32.mrb[18].mxu0 }
 0x33e   : > { %v1142_v30 = vadd.f32 %v1141_v29, %v936_v24  ;;  %v1143_v31 = vpop.f32.mrb[19].mxu0  ;;  %v1176_v33 = vmax.f32 %v1138_v26, 0.0 }
 0x33f   : > { %v1144_v32 = vadd.f32 %v1143_v31, %v940_v23  ;;  %v1177_v35 = vmax.f32 %v1140_v28, 0.0 }
 0x340   : > { %v1178_v34 = vmax.f32 %v1142_v30, 0.0 }
 0x341   : > { %v1179_v36 = vmax.f32 %v1144_v32, 0.0 }
 0x342   : > { %v1192_v37 = vpack.c.bf16 %v1178_v34, %v1176_v33 }
 0x343   : > { %v1193_v38 = vpack.c.bf16 %v1179_v36, %v1177_v35  ;;  %v1147_v39 = vpop.f32.mrb[20].mxu0 }
 0x344   : > { %v1148_v40 = vadd.f32 %v1147_v39, %v936_v24  ;;  %v1149_v41 = vpop.f32.mrb[21].mxu0 }
 0x345   : > { %v1150_v42 = vadd.f32 %v1149_v41, %v940_v23  ;;  %v1151_v43 = vpop.f32.mrb[22].mxu0  ;;  %1454 = vmatprep.mubr.bf16.mxu1 %v1193_v38 }
 0x346   : > { %v1152_v44 = vadd.f32 %v1151_v43, %v936_v24  ;;  %v1153_v45 = vpop.f32.mrb[23].mxu0  ;;  %1455 = vmatmul.mubr.bf16.vlgmr.msra.gmra.mrb[16].mxu1 %v1192_v37  ;;  %v1180_v47 = vmax.f32 %v1148_v40, 0.0 }
 0x347   : > { %v1154_v46 = vadd.f32 %v1153_v45, %v940_v23  ;;  %v1181_v49 = vmax.f32 %v1150_v42, 0.0 }
 0x348   : > { %v1182_v48 = vmax.f32 %v1152_v44, 0.0 }
 0x349   : > { %v1183_v50 = vmax.f32 %v1154_v46, 0.0 }
 0x34a   : > { %v1194_v51 = vpack.c.bf16 %v1182_v48, %v1180_v47 }
 0x34b   : > { %v1195_v52 = vpack.c.bf16 %v1183_v50, %v1181_v49  ;;  %v1157_v53 = vpop.f32.mrb[24].mxu0 }
 0x34c   : > { %v1158_v55 = vadd.f32 %v1157_v53, %v936_v24  ;;  %v1159_v57 = vpop.f32.mrb[25].mxu0 }
 0x34d   : > { %v1160_v59 = vadd.f32 %v1159_v57, %v940_v23  ;;  %v1161_v60 = vpop.f32.mrb[26].mxu0  ;;  %1464 = vmatprep.mubr.bf16.mxu1 %v1195_v52 }
 0x34e   : > { %v1162_v58 = vadd.f32 %v1161_v60, %v936_v24  ;;  %v1163_v61 = vpop.f32.mrb[27].mxu0  ;;  %1465 = vmatmul.mubr.bf16.gmra.mrb[20].mxu1 %v1194_v51  ;;  %v1184_v63 = vmax.f32 %v1158_v55, 0.0 }
 0x34f   : > { %v1164_v62 = vadd.f32 %v1163_v61, %v940_v23  ;;  %v1185_v1 = vmax.f32 %v1160_v59, 0.0 }
 0x350   : > { %v1186_v0 = vmax.f32 %v1162_v58, 0.0 }
 0x351   : > { %v1187_v2 = vmax.f32 %v1164_v62, 0.0 }
 0x352   : > { %v1196_v3 = vpack.c.bf16 %v1186_v0, %v1184_v63 }
 0x353   : > { %v1197_v4 = vpack.c.bf16 %v1187_v2, %v1185_v1  ;;  %v1167_v5 = vpop.f32.mrb[28].mxu0 }
 0x354   : > { %v1168_v6 = vadd.f32 %v1167_v5, %v936_v24  ;;  %v1169_v7 = vpop.f32.mrb[29].mxu0 }
 0x355   : > { %v1170_v8 = vadd.f32 %v1169_v7, %v940_v23  ;;  %v1171_v9 = vpop.f32.mrb[30].mxu0  ;;  %1474 = vmatprep.mubr.bf16.mxu1 %v1197_v4 }
 0x356   : > { %v1172_v10 = vadd.f32 %v1171_v9, %v936_v24  ;;  %v1173_v11 = vpop.f32.mrb[31].mxu0  ;;  %1475 = vmatmul.mubr.bf16.gmra.mrb[24].mxu1 %v1196_v3  ;;  %v1188_v13 = vmax.f32 %v1168_v6, 0.0 }
 0x357   : > { %v1174_v12 = vadd.f32 %v1173_v11, %v940_v23  ;;  %v1189_v15 = vmax.f32 %v1170_v8, 0.0 }
 0x358   : > { %v1190_v14 = vmax.f32 %v1172_v10, 0.0 }
 0x359   : > { %v1191_v16 = vmax.f32 %v1174_v12, 0.0 }
 0x35a   : > { %v1198_v17 = vpack.c.bf16 %v1190_v14, %v1188_v13 }
 0x35b   : > { %v1199_v18 = vpack.c.bf16 %v1191_v16, %v1189_v15 }
 0x35d   : > { %1484 = vmatprep.mubr.bf16.mxu1 %v1199_v18 }
 0x35e   : > { %1485 = vmatmul.mubr.bf16.gmra.mrb[28].mxu1 %v1198_v17 }
 0x419   : > { %v1456_v22 = vpop.f32.mrb[16].mxu1 }
 0x41a   : > { %v1457_v25 = vadd.f32 %v1456_v22, %v1255_v20  ;;  %v1458_v24 = vpop.f32.mrb[17].mxu1 }
 0x41b   : > { %v1459_v26 = vadd.f32 %v1458_v24, %v1259_v21  ;;  %v1460_v27 = vpop.f32.mrb[18].mxu1 }
 0x41c   : > { %v1495_v23 = vmax.f32 %v1457_v25, 0.0  ;;  %v1461_v28 = vadd.f32 %v1460_v27, %v1255_v20  ;;  %v1462_v29 = vpop.f32.mrb[19].mxu1 }
 0x41d   : > { %v1496_v30 = vmax.f32 %v1459_v26, 0.0  ;;  %v1463_v31 = vadd.f32 %v1462_v29, %v1259_v21 }
 0x41e   : > { %1511 = vst [vmem:[%s2461_s18] sm:$0xff] %v1495_v23  ;;  %v1497_v54 = vmax.f32 %v1461_v28, 0.0 }
 0x41f   : > { %1512 = vst [vmem:[%s2461_s18 + $0x8] sm:$0xff] %v1496_v30  ;;  %v1498_v56 = vmax.f32 %v1463_v31, 0.0 }
 0x420   : > { %1513 = vst [vmem:[%s2461_s18 + $0x10] sm:$0xff] %v1497_v54 }
 0x421   : > { %1514 = vst [vmem:[%s2461_s18 + $0x18] sm:$0xff] %v1498_v56  ;;  %v1466_v32 = vpop.f32.mrb[20].mxu1 }
 0x422   : > { %v1467_v33 = vadd.f32 %v1466_v32, %v1255_v20  ;;  %v1468_v34 = vpop.f32.mrb[21].mxu1 }
 0x423   : > { %v1469_v35 = vadd.f32 %v1468_v34, %v1259_v21  ;;  %v1470_v36 = vpop.f32.mrb[22].mxu1 }
 0x424   : > { %v1499_v37 = vmax.f32 %v1467_v33, 0.0  ;;  %v1471_v38 = vadd.f32 %v1470_v36, %v1255_v20  ;;  %v1472_v39 = vpop.f32.mrb[23].mxu1 }
 0x425   : > { %v1500_v40 = vmax.f32 %v1469_v35, 0.0  ;;  %v1473_v41 = vadd.f32 %v1472_v39, %v1259_v21 }
 0x426   : > { %1515 = vst [vmem:[%s2461_s18 + $0x20] sm:$0xff] %v1499_v37  ;;  %v1501_v42 = vmax.f32 %v1471_v38, 0.0 }
 0x427   : > { %1516 = vst [vmem:[%s2461_s18 + $0x28] sm:$0xff] %v1500_v40  ;;  %v1502_v43 = vmax.f32 %v1473_v41, 0.0 }
 0x428   : > { %1517 = vst [vmem:[%s2461_s18 + $0x30] sm:$0xff] %v1501_v42 }
 0x429   : > { %1518 = vst [vmem:[%s2461_s18 + $0x38] sm:$0xff] %v1502_v43  ;;  %v1476_v44 = vpop.f32.mrb[24].mxu1 }
 0x42a   : > { %v1477_v45 = vadd.f32 %v1476_v44, %v1255_v20  ;;  %v1478_v46 = vpop.f32.mrb[25].mxu1 }
 0x42b   : > { %v1479_v47 = vadd.f32 %v1478_v46, %v1259_v21  ;;  %v1480_v48 = vpop.f32.mrb[26].mxu1 }
 0x42c   : > { %v1503_v49 = vmax.f32 %v1477_v45, 0.0  ;;  %v1481_v50 = vadd.f32 %v1480_v48, %v1255_v20  ;;  %v1482_v51 = vpop.f32.mrb[27].mxu1 }
 0x42d   : > { %v1504_v52 = vmax.f32 %v1479_v47, 0.0  ;;  %v1483_v53 = vadd.f32 %v1482_v51, %v1259_v21 }
 0x42e   : > { %1519 = vst [vmem:[%s2461_s18 + $0x40] sm:$0xff] %v1503_v49  ;;  %v1505_v55 = vmax.f32 %v1481_v50, 0.0 }
 0x42f   : > { %1520 = vst [vmem:[%s2461_s18 + $0x48] sm:$0xff] %v1504_v52  ;;  %v1506_v57 = vmax.f32 %v1483_v53, 0.0 }
 0x430   : > { %1521 = vst [vmem:[%s2461_s18 + $0x50] sm:$0xff] %v1505_v55 }
 0x431   : > { %1522 = vst [vmem:[%s2461_s18 + $0x58] sm:$0xff] %v1506_v57  ;;  %v1486_v59 = vpop.f32.mrb[28].mxu1 }
 0x432   : > { %v1487_v60 = vadd.f32 %v1486_v59, %v1255_v20  ;;  %v1488_v58 = vpop.f32.mrb[29].mxu1 }
 0x433   : > { %v1489_v61 = vadd.f32 %v1488_v58, %v1259_v21  ;;  %v1490_v62 = vpop.f32.mrb[30].mxu1 }
 0x434   : > { %v1507_v63 = vmax.f32 %v1487_v60, 0.0  ;;  %v1491_v0 = vadd.f32 %v1490_v62, %v1255_v20  ;;  %v1492_v1 = vpop.f32.mrb[31].mxu1 }
 0x435   : > { %v1508_v2 = vmax.f32 %v1489_v61, 0.0  ;;  %v1493_v3 = vadd.f32 %v1492_v1, %v1259_v21 }
 0x436   : > { %1523 = vst [vmem:[%s2461_s18 + $0x60] sm:$0xff] %v1507_v63  ;;  %v1509_v4 = vmax.f32 %v1491_v0, 0.0 }
 0x437   : > { %1524 = vst [vmem:[%s2461_s18 + $0x68] sm:$0xff] %v1508_v2  ;;  %v1510_v5 = vmax.f32 %v1493_v3, 0.0 }
 0x438   : > { %1525 = vst [vmem:[%s2461_s18 + $0x70] sm:$0xff] %v1509_v4 }
 0x439   : > { %1526 = vst [vmem:[%s2461_s18 + $0x78] sm:$0xff] %v1510_v5 }
 0x43a   : > { %2152 = shalt.err (!%p2149_p2)
}
 0x43b   : > { %s2153_s25 = scalar_lea.hbm %s2481_s22, 2048  ;;  %s2157_s26 = scalar_lea.hbm %s2533_s3, 4096 }
 0x43c   : > { %p2154_p13 = scmp.ne.s32.totalorder %s2481_s22, %s2153_s25  ;;  %p2158_p4 = scmp.lt.u32.totalorder %s2481_s22, %s2533_s3 }
 0x43d   : > { %p2159_p7 = scmp.lt.u32.totalorder %s2157_s26, %s2153_s25  ;;  %p2161_p11 = scmp.lt.u32.totalorder %s2153_s25, %s2481_s22 }
 0x43e   : > { %p2155_p6 = pnand %p2154_p13, %p2547_p0 }
 0x43f   : > { %p2160_p8 = por %p2159_p7, %p2158_p4 }
 0x440   : > { %p2156_p10 = pneg %p2155_p6 }
 0x441   : > { %p2162_p1 = por %p2161_p11, %p2160_p8 }
 0x443   : > { %p2163_p3 = pnand %p2162_p1, %p2156_p10 }
 0x445   : > { %2166 = shalt.err (!%p2163_p3)
}
 0x446   : > { %s2221_s5 = smov 256   ;;  %s2222_s18 = smov 16  }
 0x447   : > { %1796 = dma.vmem_to_hbm [thread:$0]  (%p2547_p0), %s2483_s24, 2048, %s2481_s22, %s1528_s16, %s2221_s5, %s2221_s5, %s2222_s18  }
 0x448 PF: > { %s1557_s20 = sand.u32 1, %s2197_s12   ;;  %p2548_p5 = scmp.ne.s32.totalorder %s2538_s19, 0 }
 0x449   : > { %p2549_p9 = scmp.ge.s32.totalorder %s2209_s15, 2  ;;  %s1558_s27 = scalar_lea.sflag [#allocation5], %s1557_s20 }
 0x44b   : > { %p1810_p12 = pnand %p2549_p9, %p2548_p5 }
 0x44d   : > { %2192 = dma.done.wait (!%p1810_p12), %s1558_s27, 2048  }
 0x44e   : > { %2194 = vsyncadd (!%p1810_p12), %s1558_s27, 4294965248  ;;  %p17_p2 = scmp.ge.s32.totalorder %s2353_s6, 4   ;;  %s2550_s12 = smov %s2201_s13 }
 0x44f   : > { %s2551_s13 = smov %s2205_s14  ;;  %s2552_s14 = smov %s2362_s9 }
 0x450   : > { %s2553_s15 = smov %s2353_s6  ;;  %19 = sbr.rel (!%p17_p2) target bundleno = 6 (0x6), region = 91 }
 0x457   :  { %1563 = vsyncpa [#allocation4], 1 }
 0x458   :  { %1565 = vsyncpa [#allocation4 + $0x1], 1 }
 0x459   :  { %1566 = vsyncpa [#allocation7], 1 }
 0x45a   :  { %1567 = vsyncpa [#allocation5], 1 }
 0x45b   :  { %1569 = vsyncpa [#allocation5 + $0x1], 1 }

</bundles_post_ra>
